<compile_context>
chip_gen: v6e
topology: v6e:2x2x1
jax: 0.10.0
libtpu: 0.0.40
codegen_flags: <defaults>
</compile_context>

<pallas_src>
import jax
import jax.numpy as jnp
from jax import lax
from jax.experimental import pallas as pl
from jax.experimental.pallas import tpu as pltpu


def _round_up(x, m):
    return ((x + m - 1) // m) * m


# ---------------------------------------------------------------------------
# Pass 1: per-edge messages  msg_e = mask_e * (xw[src_e] + edge_feat_e @ We)
# ---------------------------------------------------------------------------
def _message_kernel(ids_ref, ef_ref, xw_ref, we_ref, msg_ref):
    # ids_ref : (TE, 8)   int32  col0 = src id, col1 = dst id, col2 = keep mask
    # ef_ref  : (TE, De)  bf16   edge features (streamed)
    # xw_ref  : (Np, Dp)  bf16   node features pre-projected by Wx (resident)
    # we_ref  : (De, Dp)  bf16   edge-feature rows of linear_msg.weight^T (resident)
    # msg_ref : (TE, Dp)  f32    per-edge messages (masked), written once per tile
    te = ids_ref.shape[0]
    n_pad = xw_ref.shape[0]

    src = ids_ref[:, 0:1]                                       # (TE, 1) int32
    mask = ids_ref[:, 2:3].astype(jnp.float32)                  # (TE, 1) 0/1

    # Gather xw[src] with a one-hot matmul on the MXU (0/1 exact in bf16,
    # f32 accumulation).  Wx is already folded in, so the gather output is
    # lane-dense (Dout_pad columns) rather than Din columns.
    src_iota = lax.broadcasted_iota(jnp.int32, (te, n_pad), 1)
    src_oh = (src_iota == src).astype(jnp.bfloat16)             # (TE, Np)
    x_src_w = jnp.dot(src_oh, xw_ref[...],
                      preferred_element_type=jnp.float32)       # (TE, Dp)

    ef_w = jnp.dot(ef_ref[...], we_ref[...],
                   preferred_element_type=jnp.float32)          # (TE, Dp)

    # Random-edge-sampling mask folded in here (padded edge slots: mask = 0).
    msg_ref[...] = (x_src_w + ef_w) * mask


# ---------------------------------------------------------------------------
# Pass 2: scatter-add messages into destination-node tiles (agg = 'add')
# ---------------------------------------------------------------------------
def _scatter_kernel(ids_ref, msg_ref, out_ref):
    # ids_ref : (TE, 8)  int32  col1 = dst id
    # msg_ref : (TE, Dp) f32    per-edge messages (already masked / zero padded)
    # out_ref : (TN, Dp) f32    output accumulator (resident across edge tiles)
    te = ids_ref.shape[0]
    tn = out_ref.shape[0]

    @pl.when(pl.program_id(1) == 0)
    def _():
        out_ref[...] = jnp.zeros_like(out_ref)

    n0 = pl.program_id(0) * tn
    dst = ids_ref[:, 1:2]                                       # (TE, 1) int32
    dst_iota = lax.broadcasted_iota(jnp.int32, (te, tn), 1)
    dst_oh = (dst_iota == (dst - n0)).astype(jnp.float32)       # (TE, TN)

    # Contract over the edge axis.  Messages stay in f32 (one-hot exact), so
    # the accumulated error does not grow with destination fan-in.
    out_ref[...] += lax.dot_general(
        dst_oh, msg_ref[...],
        dimension_numbers=(((0,), (0,)), ((), ())),
        preferred_element_type=jnp.float32)


def _vmem_limit_bytes():
    # ~100 MiB on v5e/v6e (128 MiB physical); conservative 48 MiB fallback that
    # is above the default scoped limits and safe on v7x (64 MiB VMEM / core).
    limit = 48 * 1024 * 1024
    try:
        cap = getattr(pltpu.get_tpu_info(), "vmem_capacity_bytes", None)
        if cap:
            limit = min(int(cap) * 3 // 4, 100 * 1024 * 1024)
    except Exception:
        pass
    return limit


def general_sample_edge_conv(node_feature, edge_index, edge_feature, w_msg,
                             *, keep_edge=0.5, rng_key=None, te=256, tn=256):
    """Forward pass of GeneralSampleEdgeConv.

    node_feature : (N, Din) f32
    edge_index   : (2, E)   int32  (row 0 = src, row 1 = dst)
    edge_feature : (E, De)  f32
    w_msg        : (Dout, Din + De) f32  (PyTorch nn.Linear weight layout)
    Returns (new node_feature (N, Dout) f32, edge_mask (E,) bool).
    """
    N, Din = node_feature.shape
    E = edge_index.shape[1]
    De = edge_feature.shape[1]
    Dout = w_msg.shape[0]

    # Glue (plain JAX): random edge sampling.
    # TODO(synk): torch.rand's RNG stream cannot be reproduced; jax.random is
    # used instead (same Bernoulli(keep_edge) sampling semantics).
    if rng_key is None:
        rng_key = jax.random.PRNGKey(0)
    edge_mask = jax.random.uniform(rng_key, (E,)) < keep_edge

    # Tile sizes: TE edges per step, TN output nodes per tile.
    TE = max(16, _round_up(min(te, _round_up(E, 16)), 16))
    TN = max(8, _round_up(min(tn, _round_up(N, 8)), 8))
    E_pad = _round_up(E, TE)
    N_pad = _round_up(N, TN)
    # Lane-dense columns; above 128 round to 256 so the message / scatter
    # matmuls fill the 256-wide MXU on v6e / v7x.
    Dout_pad = 128 if Dout <= 128 else _round_up(Dout, 256)

    f32, bf16 = jnp.float32, jnp.bfloat16
    w_t = w_msg.T.astype(f32)                                   # (Din + De, Dout)

    # Fold Wx into the node features once (f32 matmul in the wrapper) so the
    # in-kernel gather yields already-projected, lane-dense rows.
    xw = node_feature.astype(f32) @ w_t[:Din]                   # (N, Dout)
    xw_p = jnp.zeros((N_pad, Dout_pad), bf16).at[:N, :Dout].set(xw.astype(bf16))
    we_p = jnp.zeros((De, Dout_pad), bf16).at[:, :Dout].set(w_t[Din:].astype(bf16))
    ef_p = jnp.zeros((E_pad, De), bf16).at[:E].set(edge_feature.astype(bf16))

    # src / dst / keep-mask packed into one (E_pad, 8) int32 slab: a single
    # streamed DMA per edge tile instead of three (TE, 1) ones.
    ids_p = jnp.zeros((E_pad, 8), jnp.int32)
    ids_p = ids_p.at[:E, 0].set(edge_index[0].astype(jnp.int32))
    ids_p = ids_p.at[:E, 1].set(edge_index[1].astype(jnp.int32))
    ids_p = ids_p.at[:E, 2].set(edge_mask.astype(jnp.int32))

    vmem_limit = _vmem_limit_bytes()

    # ---- Pass 1: per-edge messages, computed once per edge tile. -----------
    edge_map1 = lambda e: (e, 0)
    const_map1 = lambda e: (0, 0)
    msg = pl.pallas_call(
        _message_kernel,
        out_shape=jax.ShapeDtypeStruct((E_pad, Dout_pad), f32),
        grid=(E_pad // TE,),
        in_specs=[
            pl.BlockSpec((TE, 8), edge_map1),              # packed src/dst/mask
            pl.BlockSpec((TE, De), edge_map1),             # edge features
            pl.BlockSpec((N_pad, Dout_pad), const_map1),   # xw (resident)
            pl.BlockSpec((De, Dout_pad), const_map1),      # We (resident)
        ],
        out_specs=pl.BlockSpec((TE, Dout_pad), edge_map1),
        compiler_params=pltpu.CompilerParams(
            dimension_semantics=("parallel",),
            vmem_limit_bytes=vmem_limit,
        ),
    )(ids_p, ef_p, xw_p, we_p)

    # ---- Pass 2: scatter-add into destination-node tiles. ------------------
    # Edge axis is the reduction ("arbitrary", innermost, output block stays
    # resident as an accumulator); node axis is independent ("parallel").
    edge_map2 = lambda n, e: (e, 0)
    out = pl.pallas_call(
        _scatter_kernel,
        out_shape=jax.ShapeDtypeStruct((N_pad, Dout_pad), f32),
        grid=(N_pad // TN, E_pad // TE),
        in_specs=[
            pl.BlockSpec((TE, 8), edge_map2),              # packed ids (streamed)
            pl.BlockSpec((TE, Dout_pad), edge_map2),       # messages (streamed)
        ],
        out_specs=pl.BlockSpec((TN, Dout_pad), lambda n, e: (n, 0)),
        compiler_params=pltpu.CompilerParams(
            dimension_semantics=("parallel", "arbitrary"),
            vmem_limit_bytes=vmem_limit,
        ),
    )(ids_p, msg)

    return out[:N, :Dout], edge_mask


def _reference(node_feature, edge_index, edge_feature, w_msg, edge_mask):
    """Pure-JAX f32 reference matching the PyTorch semantics."""
    N = node_feature.shape[0]
    src = edge_index[0]
    dst = edge_index[1]
    x_src = node_feature[src]                                   # (E, Din)
    cat = jnp.concatenate([x_src, edge_feature], axis=-1)       # (E, Din+De)
    msg = cat @ w_msg.T                                         # (E, Dout)
    msg = msg * edge_mask.astype(jnp.float32)[:, None]
    out = jnp.zeros((N, w_msg.shape[0]), jnp.float32)
    return out.at[dst].add(msg)


if __name__ == "__main__":
    # Small deterministic problem: 16 nodes, 64 edges, dim_in=8, edge_dim=4,
    # dim_out=16.
    N, E, Din, De, Dout = 16, 64, 8, 4, 16
    key = jax.random.PRNGKey(0)
    k_x, k_ei, k_ef, k_w, k_mask = jax.random.split(key, 5)

    node_feature = jax.random.normal(k_x, (N, Din), jnp.float32)
    edge_index = jax.random.randint(k_ei, (2, E), 0, N, jnp.int32)
    edge_feature = jax.random.normal(k_ef, (E, De), jnp.float32)
    # Deterministic init of linear_msg.weight: shape (dim_out, dim_in + edge_dim).
    w_msg = (jax.random.normal(k_w, (Dout, Din + De), jnp.float32)
             / jnp.sqrt(Din + De))

    # Small tiles so both grids (edge tiles; node tiles x edge tiles) are
    # actually exercised.
    out, edge_mask = general_sample_edge_conv(
        node_feature, edge_index, edge_feature, w_msg,
        keep_edge=0.5, rng_key=k_mask, te=32, tn=8)
    out = jax.block_until_ready(out)

    ref = _reference(node_feature, edge_index, edge_feature, w_msg, edge_mask)
    assert out.shape == (N, Dout)
    # bf16 MXU operands with f32 accumulation and f32 scatter -> modest
    # tolerance vs the all-f32 reference.
    assert jnp.allclose(out, ref, rtol=5e-2, atol=5e-2), \
        float(jnp.max(jnp.abs(out - ref)))
    print("KERNEL_OK")
</pallas_src>

<mosaic_0001>
module attributes {stable_mosaic.version = 11 : i64} {
  func.func @_message_kernel(%arg0: i32, %arg1: memref<32x8xi32, #tpu.memory_space<vmem>>, %arg2: memref<32x4xbf16, #tpu.memory_space<vmem>>, %arg3: memref<16x128xbf16, #tpu.memory_space<vmem>>, %arg4: memref<4x128xbf16, #tpu.memory_space<vmem>>, %arg5: memref<32x128xf32, #tpu.memory_space<vmem>>) attributes {dimension_semantics = [#tpu.dimension_semantics<parallel>], iteration_bounds = array<i64: 2>, scalar_prefetch = 0 : i64, scratch_operands = 0 : i64, tpu.core_type = #tpu.core_type<tc>, window_params = [{transform_indices = @transform_0, window_bounds = array<i64: 32, 8>}, {transform_indices = @transform_1, window_bounds = array<i64: 32, 4>}, {pipeline_mode = #tpu.pipeline_mode<synchronous>, transform_indices = @transform_2, window_bounds = array<i64: 16, 128>}, {pipeline_mode = #tpu.pipeline_mode<synchronous>, transform_indices = @transform_3, window_bounds = array<i64: 4, 128>}, {transform_indices = @transform_4, window_bounds = array<i64: 32, 128>}]} {
    %c0 = arith.constant 0 : index
    %c0_0 = arith.constant 0 : index
    %0 = vector.load %arg1[%c0, %c0_0] : memref<32x8xi32, #tpu.memory_space<vmem>>, vector<32x1xi32>
    %c0_1 = arith.constant 0 : index
    %c2 = arith.constant 2 : index
    %1 = vector.load %arg1[%c0_1, %c2] : memref<32x8xi32, #tpu.memory_space<vmem>>, vector<32x1xi32>
    %2 = arith.sitofp %1 : vector<32x1xi32> to vector<32x1xf32>
    %3 = tpu.iota {dimensions = array<i32: 1>} : vector<32x16xi32>
    %4 = vector.broadcast %0 : vector<32x1xi32> to vector<32x16xi32>
    %5 = arith.cmpi eq, %3, %4 : vector<32x16xi32>
    %6 = arith.extui %5 : vector<32x16xi1> to vector<32x16xi32>
    %7 = arith.sitofp %6 : vector<32x16xi32> to vector<32x16xf32>
    %8 = arith.truncf %7 : vector<32x16xf32> to vector<32x16xbf16>
    %c0_2 = arith.constant 0 : index
    %c0_3 = arith.constant 0 : index
    %9 = vector.load %arg3[%c0_2, %c0_3] : memref<16x128xbf16, #tpu.memory_space<vmem>>, vector<16x128xbf16>
    %cst = arith.constant dense<0.000000e+00> : vector<32x128xf32>
    %10 = tpu.matmul %8, %9, %cst {dimension_numbers = #tpu.dot_dimension_numbers<[1], [0], [0], [1], [0, 0, 1, 1], [], []>} : vector<32x16xbf16>, vector<16x128xbf16>, vector<32x128xf32> -> vector<32x128xf32>
    %c0_4 = arith.constant 0 : index
    %c0_5 = arith.constant 0 : index
    %11 = vector.load %arg2[%c0_4, %c0_5] : memref<32x4xbf16, #tpu.memory_space<vmem>>, vector<32x4xbf16>
    %c0_6 = arith.constant 0 : index
    %c0_7 = arith.constant 0 : index
    %12 = vector.load %arg4[%c0_6, %c0_7] : memref<4x128xbf16, #tpu.memory_space<vmem>>, vector<4x128xbf16>
    %cst_8 = arith.constant dense<0.000000e+00> : vector<32x128xf32>
    %13 = tpu.matmul %11, %12, %cst_8 {dimension_numbers = #tpu.dot_dimension_numbers<[1], [0], [0], [1], [0, 0, 1, 1], [], []>} : vector<32x4xbf16>, vector<4x128xbf16>, vector<32x128xf32> -> vector<32x128xf32>
    %14 = arith.addf %10, %13 : vector<32x128xf32>
    %15 = vector.broadcast %2 : vector<32x1xf32> to vector<32x128xf32>
    %16 = arith.mulf %14, %15 : vector<32x128xf32>
    %c0_9 = arith.constant 0 : index
    %c0_10 = arith.constant 0 : index
    %17 = vector.load %arg5[%c0_9, %c0_10] : memref<32x128xf32, #tpu.memory_space<vmem>>, vector<32x128xf32>
    tpu.vector_store %arg5[%c0_9, %c0_10], %16 {strides = array<i32>} : memref<32x128xf32, #tpu.memory_space<vmem>>, vector<32x128xf32>,
    return
  }
  func.func @transform_0(%arg0: i32) -> (i32, i32) {
    %c0_i32 = arith.constant 0 : i32
    %c0_i32_0 = arith.constant 0 : i32
    return %arg0, %c0_i32 : i32, i32
  }
  func.func @transform_1(%arg0: i32) -> (i32, i32) {
    %c0_i32 = arith.constant 0 : i32
    %c0_i32_0 = arith.constant 0 : i32
    return %arg0, %c0_i32 : i32, i32
  }
  func.func @transform_2(%arg0: i32) -> (i32, i32) {
    %c0_i32 = arith.constant 0 : i32
    %c0_i32_0 = arith.constant 0 : i32
    %c0_i32_1 = arith.constant 0 : i32
    return %c0_i32, %c0_i32_0 : i32, i32
  }
  func.func @transform_3(%arg0: i32) -> (i32, i32) {
    %c0_i32 = arith.constant 0 : i32
    %c0_i32_0 = arith.constant 0 : i32
    %c0_i32_1 = arith.constant 0 : i32
    return %c0_i32, %c0_i32_0 : i32, i32
  }
  func.func @transform_4(%arg0: i32) -> (i32, i32) {
    %c0_i32 = arith.constant 0 : i32
    %c0_i32_0 = arith.constant 0 : i32
    return %arg0, %c0_i32 : i32, i32
  }
}

</mosaic_0001>

<bundles_post_ra>
// kernel: tpu_custom_call.1
= control target key start
LH: loop header
LB: loop body
LE: loop exit
PB: predicated region body
PF: predicated region fallthrough
CT: control target
= control target key end

     0   :  { %9 = vsyncpa [#allocation3], 0  ;;  %s812_s0 = inlined_call_operand.vmem [shape: s32[64,8], index: 0, kind: input, shape index: {}]   ;;  %s813_s1 = inlined_call_operand.vmem [shape: bf16[64,4], index: 1, kind: input, shape index: {}]   ;;  %s814_s2 = inlined_call_operand.vmem [shape: bf16[16,128], index: 2, kind: input, shape index: {}]   ;;  %s815_s3 = inlined_call_operand.vmem [shape: bf16[4,128], index: 3, kind: input, shape index: {}]   ;;  %s816_s4 = inlined_call_operand.hbm [shape: f32[64,128], index: 4, kind: output, shape index: {}]  }
   0x1   :  { %11 = vsyncpa [#allocation3 + $0x1], 0  ;;  %s702_s15 = smov 0   ;;  %s704_s16 = smov 0  }
   0x2   :  { %s706_s17 = smov 0   ;;  %s708_s18 = smov 0  }
   0x3 LB: > { %s723_s19 = sadd.s32 4294967295, %s669_s18   ;;  %s513_s20 = sadd.s32 4294967294, %s669_s18   ;;  %s669_s18 = sphi %s708_s18, %s822_s18   ;;  %s665_s17 = sphi %s706_s17, %s821_s17   ;;  %s661_s16 = sphi %s704_s16, %s820_s16   ;;  %s657_s15 = sphi %s702_s15, %s819_s15  }
   0x4   : > { %s727_s21 = sadd.s32 1, %s669_s18   ;;  %s118_s22 = sadd.s32 1, %s665_s17 }
   0x5   : > { %s115_s23 = ssub.s32 %s669_s18, %s727_s21  ;;  %p128_p0 = scmp.ne.s32.totalorder %s665_s17, %s661_s16 }
   0x6   : > { %p116_p1 = scmp.eq.s32.totalorder %s115_s23, 0  ;;  %p129_p2 = scmp.eq.s32.totalorder %s723_s19, 1 }
   0x7   : > { %p134_p3 = scmp.ne.s32.totalorder %s661_s16, %s657_s15  ;;  %p135_p4 = scmp.eq.s32.totalorder %s513_s20, 1 }
   0x8   : > { %s738_s24 = scalar_select %p116_p1, %s665_s17, %s118_s22  }
   0x9   : > { %p740_p5 = por %p129_p2, %p128_p0  ;;  %p744_p6 = por %p135_p4, %p134_p3 }
   0xa   : > { %p516_p7 = scmp.ge.s32.totalorder %s669_s18, 1  ;;  %p177_p8 = scmp.lt.s32.totalorder %s669_s18, 3 }
   0xc   : > { %p178_p9 = pnand %p516_p7, %p177_p8 }
   0xd   : > { %s518_s27 = sshll.u32 (!%p178_p9), %s723_s19, 2  ;;  %s205_s14 = sand.u32 (!%p178_p9), 1, %s661_s16  }
   0xe   : > { %181 = sbr.rel (%p178_p9) target bundleno = 373 (0x175), region = 36  ;;  %p209_p10 = scmp.lt.s32.totalorder (!%p178_p9), %s518_s27, 7 }
   0xf   : > { %s517_s20 = sshll.u32 (!%p178_p9), %s205_s14, 5  ;;  %s674_s6 = smov (!%p178_p9), [#allocation2]  }
  0x10   : > { %s207_s22 = scalar_lea.vmem (!%p178_p9), [#allocation2], %s517_s20  ;;  %s613_s7 = sshll.u32 (!%p178_p9), %s674_s6, 4  ;;  %s614_s7 = int_to_ptr.vmem [resolvable:$false] %s613_s7 }
  0x11   : > { %s439_s23 = sshll.u32 (!%p178_p9), %s207_s22, 4  ;;  %s765_s23 = int_to_ptr.vmem [resolvable:$true] %s439_s23 }
  0x12   : > { %p616_p0 = scmp.lt.s32.totalorder (!%p178_p9), %s765_s23, %s614_s7 }
  0x13   : > { %v264_v0 = vld [vmem:[%s815_s3] sm:$0x3]  ;;  %vm282_vm0 = vcmask 1041408   ;;  %v671_v1 = vmov 0   ;;  %s824_s27 = smov (!%p209_p10, %s518_s27), 7  ;;  %vm275_vm1 = vcmask 31744   ;;  %v230_v15 = vlaneseq }
  0x14   : > { %603 = vset.pattern.permute.xlu1 %v671_v1  ;;  %602 = vset.pattern.permute.xlu0 %v671_v1  ;;  %v284_v2 = vsel %vm282_vm0, %v264_v0, 0  ;;  %s519_s30 = sshll.u32 %s824_s27, 3  ;;  %s521_s5 = sshll.u32 %s824_s27, 2  ;;  %v608_v9 = vld [vmem:[%s814_s2] sm:$0xff]   ;;  %v672_v12 = vmov 2   ;;  %vm341_vm6 = vcmask 130048  }
  0x15   : > { %557 = vmatprep.subr.msk.bf16.mxu0 %vm282_vm0, %v264_v0  ;;  %s212_s8 = scalar_lea.vmem %s812_s0, %s519_s30  ;;  %s218_s11 = scalar_lea.vmem %s813_s1, %s521_s5  ;;  %551 = vmatprep.subr.bf16.mxu1 %v608_v9  ;;  %v231_v16 = vand.u32 127, %v230_v15  ;;  %v673_v21 = vmov 0.0  }
  0x16   : > { %546 = vmatpush3.bf16.msra.mxu0 %v284_v2  ;;  %v224_v3 = vld [vmem:[%s212_s8 + $0x10] sm:$0xff]  ;;  %v222_v4 = vld [vmem:[%s212_s8] sm:$0xff]  ;;  %v225_v5 = vld [vmem:[%s212_s8 + $0x18] sm:$0xff]  ;;  %552 = vmatpush3.bf16.msra.mxu1 %v608_v9  ;;  %s538_s27 = sshll.u32 %s723_s19, 9  ;;  %s772_s5 = scalar_lea.sflag [#allocation3], %s205_s14 }
  0x17   : > { %239 = vperm.xlu1 %603, %v224_v3   ;;  %233 = vperm.xlu0 %602, %v222_v4   ;;  %v223_v6 = vld [vmem:[%s212_s8 + $0x8] sm:$0xff]  ;;  %v606_v7 = vld [vmem:[%s218_s11] sm:$0xff]   ;;  %v226_v10 = vcvt.s32.f32 %v222_v4  ;;  %v228_v13 = vcvt.s32.f32 %v224_v3  ;;  %v229_v14 = vcvt.s32.f32 %v225_v5  ;;  %s770_s30 = scalar_lea.hbm %s816_s4, %s538_s27  ;;  %s609_s19 = scalar_lea.vmem %s765_s23, 512 }
  0x18   : > { %v607_v8 = vld [vmem:[%s218_s11 + $0x8] sm:$0xff]   ;;  %547 = vmatprep.mubr.msk.bf16.mxu0 %vm275_vm1, %v606_v7  ;;  %v227_v11 = vcvt.s32.f32 %v223_v6  ;;  %p610_p11 = scmp.ne.s32.totalorder %s765_s23, %s609_s19  ;;  %s615_s8 = scalar_lea.vmem %s614_s7, 1024 }
  0x19   : > { %548 = vmatmul.mubr.msk.bf16.vlgmr.msra.gmra.mxu0 %vm275_vm1, %v607_v8  ;;  %p617_p1 = scmp.lt.s32.totalorder %s615_s8, %s609_s19 }
  0x1a   : > { %p611_p12 = pnand %p610_p11, %p740_p5 }
  0x1b   : > { %242 = vperm.xlu1 %603, %v225_v5   ;;  %236 = vperm.xlu0 %602, %v223_v6   ;;  %p618_p2 = por %p617_p1, %p616_p0 }
  0x1c   : > { %p612_p13 = pneg %p611_p12 }
  0x1e   : > { %p619_p3 = pnand %p618_p2, %p612_p13 }
  0x1f   : > { %605 = vset.pattern.permute.xlu1 %v672_v12  ;;  %604 = vset.pattern.permute.xlu0 %v672_v12 }
  0x20   : > { %404 = vperm.xlu1 %605, %v227_v11   ;;  %399 = vperm.xlu0 %604, %v226_v10  }
  0x24   : > { %409 = vperm.xlu1 %605, %v228_v13   ;;  %414 = vperm.xlu0 %604, %v229_v14  }
  0x92   : > { %v240_v17 = vpop.permute.xlu1 %239  ;;  %v234_v18 = vpop.permute.xlu0 %233 }
  0x93   : > { %vm246_vm2 = vcmp.eq.s32.totalorder %v231_v16, %v240_v17  ;;  %vm244_vm3 = vcmp.eq.s32.totalorder %v231_v16, %v234_v18 }
  0x94   : > { %v524_v22 = vsel %vm246_vm2, 1.0, %v673_v21  ;;  %v522_v23 = vsel %vm244_vm3, 1.0, %v673_v21 }
  0x96   : > { %v243_v19 = vpop.permute.xlu1 %242  ;;  %v237_v20 = vpop.permute.xlu0 %236 }
  0x97   : > { %vm247_vm4 = vcmp.eq.s32.totalorder %v231_v16, %v243_v19  ;;  %vm245_vm5 = vcmp.eq.s32.totalorder %v231_v16, %v237_v20 }
  0x98   : > { %v525_v24 = vsel %vm247_vm4, 1.0, %v673_v21  ;;  %v523_v25 = vsel %vm245_vm5, 1.0, %v673_v21 }
  0x99   : > { %v257_v26 = vpack.c.bf16 %v525_v24, %v524_v22  ;;  %v256_v27 = vpack.c.bf16 %v523_v25, %v522_v23 }
  0x9b   : > { %553 = vmatprep.mubr.msk.bf16.mxu1 %vm341_vm6, %v256_v27  ;;  %v405_v29 = vpop.permute.xlu1 %404  ;;  %v400_v31 = vpop.permute.xlu0 %399 }
  0x9c   : > { %554 = vmatmul.mubr.msk.bf16.vlgmr.msra.gmra.mxu1 %vm341_vm6, %v257_v26 }
  0x9f   : > { %v410_v33 = vpop.permute.xlu1 %409  ;;  %v415_v42 = vpop.permute.xlu0 %414 }
  0xd9   : > { %v549_v28 = vpop.f32.mrf.mxu0 }
  0xdb   : > { %v320_v30 = vpop.f32.mrf.mxu0 }
  0xdd   : > { %v550_v35 = vpop.f32.mrf.mxu0 }
  0xdf   : > { %v323_v43 = vpop.f32.mrf.mxu0 }
 0x15c   : > { %v555_v32 = vpop.f32.mrf.mxu1 }
 0x15d   : > { %v391_v34 = vadd.f32 %v555_v32, %v549_v28 }
 0x15e   : > { %v382_v36 = vpop.f32.mrf.mxu1 }
 0x15f   : > { %v419_v37 = vmul.f32 %v410_v33, %v391_v34  ;;  %v383_v38 = vadd.f32 %v382_v36, %v320_v30 }
 0x160   : > { %v556_v39 = vpop.f32.mrf.mxu1 }
 0x161   : > { %423 = vst [vmem:[%s207_s22 + $0x10] sm:$0xff] %v419_v37  ;;  %v417_v40 = vmul.f32 %v400_v31, %v383_v38  ;;  %v394_v41 = vadd.f32 %v556_v39, %v550_v35 }
 0x162   : > { %v385_v44 = vpop.f32.mrf.mxu1 }
 0x163   : > { %421 = vst [vmem:[%s207_s22] sm:$0xff] %v417_v40  ;;  %v420_v45 = vmul.f32 %v415_v42, %v394_v41  ;;  %v386_v46 = vadd.f32 %v385_v44, %v323_v43 }
 0x165   : > { %424 = vst [vmem:[%s207_s22 + $0x18] sm:$0xff] %v420_v45  ;;  %v418_v47 = vmul.f32 %v405_v29, %v386_v46 }
 0x167   : > { %422 = vst [vmem:[%s207_s22 + $0x8] sm:$0xff] %v418_v47 }
 0x168   : > { %622 = shalt.err (!%p619_p3)
}
 0x169   : > { %s623_s9 = scalar_lea.hbm %s770_s30, 512  ;;  %s627_s12 = scalar_lea.hbm %s816_s4, 1024 }
 0x16a   : > { %p624_p4 = scmp.ne.s32.totalorder %s770_s30, %s623_s9  ;;  %p628_p9 = scmp.lt.s32.totalorder %s770_s30, %s816_s4 }
 0x16b   : > { %p629_p10 = scmp.lt.s32.totalorder %s627_s12, %s623_s9 }
 0x16c   : > { %p625_p7 = pnand %p624_p4, %p740_p5 }
 0x16d   : > { %p630_p11 = por %p629_p10, %p628_p9 }
 0x16e   : > { %p626_p8 = pneg %p625_p7 }
 0x170   : > { %p631_p12 = pnand %p630_p11, %p626_p8 }
 0x172   : > { %634 = shalt.err (!%p631_p12)
}
 0x173   : > { %s675_s20 = smov 128   ;;  %s676_s22 = smov 8  }
 0x174   : > { %558 = dma.vmem_to_hbm [thread:$0]  (%p740_p5), %s765_s23, 512, %s770_s30, %s772_s5, %s675_s20, %s675_s20, %s676_s22  }
 0x175 PF: > { %p564_p13 = scmp.ge.s32.totalorder %s669_s18, 2  ;;  %s454_s27 = sand.u32 1, %s657_s15  }
 0x176   : > { %s455_s28 = scalar_lea.sflag [#allocation3], %s454_s27 }
 0x177   : > { %p561_p0 = pnand %p564_p13, %p744_p6 }
 0x179   : > { %p562_p1 = pneg %p561_p0 }
 0x17b   : > { %652 = dma.done.wait (%p562_p1), %s455_s28, 512  }
 0x17c   : > { %654 = vsyncadd (%p562_p1), %s455_s28, 4294966784  ;;  %p14_p2 = scmp.ge.s32.totalorder %s727_s21, 4   ;;  %s819_s15 = smov %s661_s16 }
 0x17d   : > { %s820_s16 = smov %s665_s17  ;;  %s821_s17 = smov %s738_s24 }
 0x17e   : > { %s822_s18 = smov %s727_s21  ;;  %16 = sbr.rel (!%p14_p2) target bundleno = 3 (0x3), region = 74 }
 0x183   :  { %460 = vsyncpa [#allocation3], 1 }
 0x184   :  { %462 = vsyncpa [#allocation3 + $0x1], 1 }

</bundles_post_ra>
